<compile_context>
chip_gen: v7x
topology: tpu7x:2x2x1
jax: 0.10.0
libtpu: 0.0.40
codegen_flags: <defaults>
</compile_context>

<pallas_src>
import math

import jax
import jax.numpy as jnp
from jax.experimental import pallas as pl
from jax.experimental.pallas import tpu as pltpu

GP_PARAMS_DIM = 16  # docstring says 14 but indices run to 15 (Constant)


class ParsingError(Exception):
    pass


def get_interval(center, range_):
    return (center - range_ / 2, center + range_ / 2)


_PERIODIC_SLOTS = {   # char -> (scale idx, period idx, lengthscale idx, period center)
    '1': (3, 4, 5, 0.2),
    '2': (6, 7, 8, 0.5),
    '3': (9, 10, 11, 1.0),
    '4': (12, 13, 14, 1.5),
}


class KernelParser:
    """Recursive-descent parser (mirrors the PyTorch module).

    Produces:
      * self.ast: nested ('op', payload) tuples.  Leaf payloads carry both the
        primitive transformed params (used by the pure-JAX reference) and the
        indices of the pre-folded multiply-only coefficients that the Pallas
        kernel reads from SMEM.
      * self.flat_params: list of jnp f32 scalars (the kernel coefficients).
    """

    def __init__(self, expression, raw_params, param_range=0.02):
        self.expression = expression
        self.index = 0
        self.raw_params = raw_params          # [num_base_kernels, 16]
        self.raw_params_index = 0
        self.param_range = param_range
        self.flat_params = []
        self.ast = self.getValue()

    # ---- parameter transforms ----
    def _transform(self, raw, center):
        min_val, max_val = get_interval(center, self.param_range)
        return (jax.nn.sigmoid(raw) * (max_val - min_val) + min_val).astype(jnp.float32)

    def _push(self, value):
        self.flat_params.append(jnp.asarray(value, jnp.float32))
        return len(self.flat_params) - 1

    # ---- parser ----
    def getValue(self):
        value = self.parseExpression()
        if self.hasNext():
            raise ParsingError(
                "Unexpected character found: '%s' at index %d" % (self.peek(), self.index))
        return value

    def peek(self):
        return self.expression[self.index:self.index + 1]

    def hasNext(self):
        return self.index < len(self.expression)

    def parseExpression(self):
        return self.parseAddition()

    def parseAddition(self):
        values = [self.parseMultiplication()]
        while self.peek() == '+':
            self.index += 1
            values.append(self.parseMultiplication())
        return values[0] if len(values) == 1 else ('+', tuple(values))

    def parseMultiplication(self):
        values = [self.parseParenthesis()]
        while self.peek() == '*':
            self.index += 1
            values.append(self.parseParenthesis())
        return values[0] if len(values) == 1 else ('*', tuple(values))

    def parseParenthesis(self):
        if self.peek() == '(':
            self.index += 1
            value = self.parseExpression()
            if self.peek() != ')':
                raise ParsingError('No closing parenthesis found at character %d' % self.index)
            self.index += 1
            return value
        return self.parseValue()

    def parseValue(self):
        char = self.peek()
        self.index += 1
        if self.raw_params_index < len(self.raw_params):
            raw_param = self.raw_params[self.raw_params_index]
            self.raw_params_index += 1
        else:
            # Explicit error (the PyTorch code would hit an UnboundLocalError).
            raise ParsingError(
                'Expression has more base kernels than raw_params rows (%d)'
                % len(self.raw_params))
        if char == 'W':
            s2 = self._transform(raw_param[0], 0.5)
            return ('WhiteNoise', {'s2': s2, 'i_s2': self._push(s2)})
        elif char == 'R':
            s2 = self._transform(raw_param[1], 0.5)
            l2 = self._transform(raw_param[2], 0.5)
            return ('RBF', {'s2': s2, 'l2': l2,
                            'i_s2': self._push(s2),
                            'i_coef': self._push(-0.5 / l2)})          # exp(d^2 * coef)
        elif char in _PERIODIC_SLOTS:
            i_s, i_p, i_l, p_center = _PERIODIC_SLOTS[char]
            s2 = self._transform(raw_param[i_s], 0.5)
            period = self._transform(raw_param[i_p], p_center)
            l2 = self._transform(raw_param[i_l], 0.5)
            return ('ExpSinSq', {'s2': s2, 'period': period, 'l2': l2,
                                 'i_s2': self._push(s2),
                                 'i_freq': self._push(math.pi / period),   # sin(|d| * freq)
                                 'i_coef': self._push(-2.0 / l2)})         # exp(sin^2 * coef)
        elif char == 'C':
            const = self._transform(raw_param[15], 0.5)
            return ('Constant', {'const': const, 'i_const': self._push(const)})
        else:
            raise ParsingError('Cannot parse char: ' + str(char))


# ----------------------------- AST helpers -----------------------------------

def _leaf_ops(node, acc=None):
    if acc is None:
        acc = set()
    if node[0] in ('+', '*'):
        for child in node[1]:
            _leaf_ops(child, acc)
    else:
        acc.add(node[0])
    return acc


def _cost_per_elem(node):
    """(flops, transcendentals) per output element for the AST."""
    op = node[0]
    if op in ('+', '*'):
        f = t = 0
        for child in node[1]:
            cf, ct = _cost_per_elem(child)
            f += cf
            t += ct
        return f + len(node[1]) - 1, t
    if op == 'WhiteNoise':
        return 2, 0
    if op == 'RBF':
        return 3, 1        # mul, exp, mul
    if op == 'ExpSinSq':
        return 5, 2        # mul, sin, square, mul, exp, mul (approx.)
    if op == 'Constant':
        return 0, 0
    raise ParsingError('Cannot parse kernel op %s' % op)


def _emit_cov(node, ctx, param):
    """Emit covariance for one AST node on the flat (Bblk, T1*T2) tile.

    Constant nodes return a scalar and fold into the parent +/* via
    broadcasting (no full tile of ones is materialized)."""
    op = node[0]
    if op == '+':
        out = _emit_cov(node[1][0], ctx, param)
        for child in node[1][1:]:
            out = out + _emit_cov(child, ctx, param)
        return out
    if op == '*':
        out = _emit_cov(node[1][0], ctx, param)
        for child in node[1][1:]:
            out = out * _emit_cov(child, ctx, param)
        return out
    info = node[1]
    if op == 'WhiteNoise':
        return ctx['eq'] * param(info['i_s2'])
    if op == 'RBF':
        return jnp.exp(ctx['d2'] * param(info['i_coef'])) * param(info['i_s2'])
    if op == 'ExpSinSq':
        s = jnp.sin(ctx['ad'] * param(info['i_freq']))
        return jnp.exp((s * s) * param(info['i_coef'])) * param(info['i_s2'])
    if op == 'Constant':
        return param(info['i_const'])
    raise ParsingError('Cannot parse kernel op %s' % op)


def _choose_batch_block(B, T1, T2, vmem_budget_bytes=8 * 1024 * 1024):
    """Largest batch block whose double-buffered in/out tiles fit the budget.

    Prefers divisors of B (no partial edge blocks), aligned to a multiple of 8
    (sublane-aligned second-to-last block dim) when possible."""
    per_row = 4 * (T1 * T2 + T1 + T2) * 2     # f32, x2 for double buffering
    cap = max(1, vmem_budget_bytes // per_row)
    if B <= cap:
        return B
    divisors = [d for d in range(1, cap + 1) if B % d == 0]
    aligned = [d for d in divisors if d % 8 == 0]
    return (aligned or divisors)[-1]


# ----------------------------- Pallas wrapper ---------------------------------

def gp_covariance(expression, raw_params, x_1, x_2, param_range=0.02):
    """Pallas equivalent of Kernel(expression, raw_params).forward(x_1, x_2).

    Args:
        expression: str over W R 1 2 3 4 C + * ( )
        raw_params: [num_base_kernels, 16] float32
        x_1: [B, T1, 1] float32
        x_2: [B, 1, T2] float32
    Returns:
        [B, T1, T2] float32 covariance.
    """
    parser = KernelParser(expression, raw_params, param_range)
    ast = parser.ast
    params_flat = jnp.stack(parser.flat_params).astype(jnp.float32)

    B, T1, _ = x_1.shape
    T2 = x_2.shape[-1]
    N = T1 * T2

    x1_rows = x_1.reshape(B, T1).astype(jnp.float32)
    x2_rows = x_2.reshape(B, T2).astype(jnp.float32)

    leaves = _leaf_ops(ast)
    needs_eq = 'WhiteNoise' in leaves
    needs_sq = 'RBF' in leaves
    needs_abs = 'ExpSinSq' in leaves

    b_blk = _choose_batch_block(B, T1, T2)

    def kernel(params_ref, x1_ref, x2_ref, o_ref):
        x1 = x1_ref[...]                      # (b_blk, T1)
        x2 = x2_ref[...]                      # (b_blk, T2)
        ctx = {}
        if needs_sq or needs_abs:
            # Flat outer difference d[b, i*T2 + j] = x1[b, i] - x2[b, j], built
            # with lane broadcasts + one concat (no in-kernel reshape/relayout).
            # Hoisted once per tile and shared by every RBF/ExpSinSq leaf.
            d = jnp.concatenate([x1[:, i:i + 1] - x2 for i in range(T1)], axis=-1)
            if needs_abs:
                ctx['ad'] = jnp.abs(d)
            if needs_sq:
                ctx['d2'] = d * d
        if needs_eq:
            # Exact-equality mask computed from the raw values (bit-faithful to
            # the PyTorch (x_1 == x_2) diagonal; not re-derived from d).
            ctx['eq'] = jnp.concatenate(
                [(x1[:, i:i + 1] == x2).astype(jnp.float32) for i in range(T1)],
                axis=-1)
        res = _emit_cov(ast, ctx, lambda i: params_ref[i])
        if jnp.ndim(res) != 2:                # constant-only expression -> scalar
            res = jnp.broadcast_to(res, (o_ref.shape[0], o_ref.shape[1]))
        o_ref[...] = res
        # TODO(synk): the PyTorch module raises RuntimeError on NaN; there is no
        # in-kernel exception mechanism, so callers must isnan-check outside.

    flops_pe, transc_pe = _cost_per_elem(ast)
    cost = pl.CostEstimate(
        flops=int(flops_pe) * B * N,
        transcendentals=int(transc_pe) * B * N,
        bytes_accessed=4 * (B * N + B * T1 + B * T2 + int(params_flat.size)))

    out_flat = pl.pallas_call(
        kernel,
        out_shape=jax.ShapeDtypeStruct((B, N), jnp.float32),
        grid=(pl.cdiv(B, b_blk),),
        in_specs=[
            pl.BlockSpec(memory_space=pltpu.MemorySpace.SMEM),   # scalar coefficients
            pl.BlockSpec((b_blk, T1), lambda b: (b, 0)),
            pl.BlockSpec((b_blk, T2), lambda b: (b, 0)),
        ],
        out_specs=pl.BlockSpec((b_blk, N), lambda b: (b, 0)),    # lane-dense slab
        compiler_params=pltpu.CompilerParams(
            dimension_semantics=("parallel",),
            # 32 MiB scoped VMEM: above the v5e/v6e defaults, <= half of v7x's
            # 64 MiB physical VMEM (block budget above is ~8 MiB anyway).
            vmem_limit_bytes=32 * 1024 * 1024),
        cost_estimate=cost,
    )(params_flat, x1_rows, x2_rows)

    return out_flat.reshape(B, T1, T2)


# ----------------------------- pure-JAX reference -----------------------------

def _ref_eval(node, x1, x2):
    op = node[0]
    if op == '+':
        out = _ref_eval(node[1][0], x1, x2)
        for child in node[1][1:]:
            out = out + _ref_eval(child, x1, x2)
        return out
    if op == '*':
        out = _ref_eval(node[1][0], x1, x2)
        for child in node[1][1:]:
            out = out * _ref_eval(child, x1, x2)
        return out
    info = node[1]
    if op == 'WhiteNoise':
        return (x1 == x2).astype(jnp.float32) * info['s2']
    if op == 'RBF':
        return jnp.exp(-(x1 - x2) ** 2 / (2.0 * info['l2'])) * info['s2']
    if op == 'ExpSinSq':
        return jnp.exp(
            -2.0 * jnp.sin(math.pi * jnp.abs(x1 - x2) / info['period']) ** 2 / info['l2']
        ) * info['s2']
    if op == 'Constant':
        return jnp.ones((x1.shape[0], x1.shape[1], x2.shape[2]), jnp.float32) * info['const']
    raise ParsingError('Cannot parse kernel op %s' % op)


def gp_covariance_reference(expression, raw_params, x_1, x_2, param_range=0.02):
    """Pure-JAX reference mirroring the PyTorch forward, for validation."""
    parser = KernelParser(expression, raw_params, param_range)
    return _ref_eval(parser.ast, x_1.astype(jnp.float32), x_2.astype(jnp.float32))


if __name__ == "__main__":
    key = jax.random.PRNGKey(0)
    k1, k2 = jax.random.split(key)

    expression = "(W+R)*1+C"          # 4 base kernels: W, R, Per_S, Constant
    num_base_kernels = 4
    batch_size, T1, T2 = 2, 16, 16

    raw_params = jax.random.normal(k1, (num_base_kernels, GP_PARAMS_DIM), jnp.float32)
    x = jnp.linspace(0.0, 1.0, T1, dtype=jnp.float32)
    x_batch = x[None, :] + 0.01 * jax.random.normal(k2, (batch_size, T1), jnp.float32)
    x_1 = x_batch[:, :, None]          # [B, T1, 1]
    x_2 = x_batch[:, None, :]          # [B, 1, T2]

    cov = jax.block_until_ready(gp_covariance(expression, raw_params, x_1, x_2))
    ref = jax.block_until_ready(gp_covariance_reference(expression, raw_params, x_1, x_2))

    assert cov.shape == (batch_size, T1, T2)
    assert bool(jnp.all(jnp.isfinite(cov)))
    max_err = float(jnp.max(jnp.abs(cov - ref)))
    assert bool(jnp.allclose(cov, ref, atol=1e-4, rtol=1e-3)), max_err

    print("KERNEL_OK")
</pallas_src>

<mosaic_0001>
module attributes {stable_mosaic.version = 11 : i64} {
  func.func @kernel(%arg0: i32, %arg1: memref<7xf32, #tpu.memory_space<smem>>, %arg2: memref<2x16xf32, #tpu.memory_space<vmem>>, %arg3: memref<2x16xf32, #tpu.memory_space<vmem>>, %arg4: memref<2x256xf32, #tpu.memory_space<vmem>>) attributes {dimension_semantics = [#tpu.dimension_semantics<parallel>], iteration_bounds = array<i64: 1>, scalar_prefetch = 0 : i64, scratch_operands = 0 : i64, tpu.core_type = #tpu.core_type<tc>, window_params = [{transform_indices = @transform_0, window_bounds = array<i64: 7>}, {transform_indices = @transform_1, window_bounds = array<i64: 2, 16>}, {transform_indices = @transform_2, window_bounds = array<i64: 2, 16>}, {transform_indices = @transform_3, window_bounds = array<i64: 2, 256>}]} {
    %c0 = arith.constant 0 : index
    %c0_0 = arith.constant 0 : index
    %0 = vector.load %arg2[%c0, %c0_0] : memref<2x16xf32, #tpu.memory_space<vmem>>, vector<2x16xf32>
    %c0_1 = arith.constant 0 : index
    %c0_2 = arith.constant 0 : index
    %1 = vector.load %arg3[%c0_1, %c0_2] : memref<2x16xf32, #tpu.memory_space<vmem>>, vector<2x16xf32>
    %2 = vector.extract_strided_slice %0 {offsets = [0, 0], sizes = [2, 1], strides = [1, 1]} : vector<2x16xf32> to vector<2x1xf32>
    %3 = vector.broadcast %2 : vector<2x1xf32> to vector<2x16xf32>
    %4 = arith.subf %3, %1 : vector<2x16xf32>
    %5 = vector.extract_strided_slice %0 {offsets = [0, 1], sizes = [2, 1], strides = [1, 1]} : vector<2x16xf32> to vector<2x1xf32>
    %6 = vector.broadcast %5 : vector<2x1xf32> to vector<2x16xf32>
    %7 = arith.subf %6, %1 : vector<2x16xf32>
    %8 = vector.extract_strided_slice %0 {offsets = [0, 2], sizes = [2, 1], strides = [1, 1]} : vector<2x16xf32> to vector<2x1xf32>
    %9 = vector.broadcast %8 : vector<2x1xf32> to vector<2x16xf32>
    %10 = arith.subf %9, %1 : vector<2x16xf32>
    %11 = vector.extract_strided_slice %0 {offsets = [0, 3], sizes = [2, 1], strides = [1, 1]} : vector<2x16xf32> to vector<2x1xf32>
    %12 = vector.broadcast %11 : vector<2x1xf32> to vector<2x16xf32>
    %13 = arith.subf %12, %1 : vector<2x16xf32>
    %14 = vector.extract_strided_slice %0 {offsets = [0, 4], sizes = [2, 1], strides = [1, 1]} : vector<2x16xf32> to vector<2x1xf32>
    %15 = vector.broadcast %14 : vector<2x1xf32> to vector<2x16xf32>
    %16 = arith.subf %15, %1 : vector<2x16xf32>
    %17 = vector.extract_strided_slice %0 {offsets = [0, 5], sizes = [2, 1], strides = [1, 1]} : vector<2x16xf32> to vector<2x1xf32>
    %18 = vector.broadcast %17 : vector<2x1xf32> to vector<2x16xf32>
    %19 = arith.subf %18, %1 : vector<2x16xf32>
    %20 = vector.extract_strided_slice %0 {offsets = [0, 6], sizes = [2, 1], strides = [1, 1]} : vector<2x16xf32> to vector<2x1xf32>
    %21 = vector.broadcast %20 : vector<2x1xf32> to vector<2x16xf32>
    %22 = arith.subf %21, %1 : vector<2x16xf32>
    %23 = vector.extract_strided_slice %0 {offsets = [0, 7], sizes = [2, 1], strides = [1, 1]} : vector<2x16xf32> to vector<2x1xf32>
    %24 = vector.broadcast %23 : vector<2x1xf32> to vector<2x16xf32>
    %25 = arith.subf %24, %1 : vector<2x16xf32>
    %26 = vector.extract_strided_slice %0 {offsets = [0, 8], sizes = [2, 1], strides = [1, 1]} : vector<2x16xf32> to vector<2x1xf32>
    %27 = vector.broadcast %26 : vector<2x1xf32> to vector<2x16xf32>
    %28 = arith.subf %27, %1 : vector<2x16xf32>
    %29 = vector.extract_strided_slice %0 {offsets = [0, 9], sizes = [2, 1], strides = [1, 1]} : vector<2x16xf32> to vector<2x1xf32>
    %30 = vector.broadcast %29 : vector<2x1xf32> to vector<2x16xf32>
    %31 = arith.subf %30, %1 : vector<2x16xf32>
    %32 = vector.extract_strided_slice %0 {offsets = [0, 10], sizes = [2, 1], strides = [1, 1]} : vector<2x16xf32> to vector<2x1xf32>
    %33 = vector.broadcast %32 : vector<2x1xf32> to vector<2x16xf32>
    %34 = arith.subf %33, %1 : vector<2x16xf32>
    %35 = vector.extract_strided_slice %0 {offsets = [0, 11], sizes = [2, 1], strides = [1, 1]} : vector<2x16xf32> to vector<2x1xf32>
    %36 = vector.broadcast %35 : vector<2x1xf32> to vector<2x16xf32>
    %37 = arith.subf %36, %1 : vector<2x16xf32>
    %38 = vector.extract_strided_slice %0 {offsets = [0, 12], sizes = [2, 1], strides = [1, 1]} : vector<2x16xf32> to vector<2x1xf32>
    %39 = vector.broadcast %38 : vector<2x1xf32> to vector<2x16xf32>
    %40 = arith.subf %39, %1 : vector<2x16xf32>
    %41 = vector.extract_strided_slice %0 {offsets = [0, 13], sizes = [2, 1], strides = [1, 1]} : vector<2x16xf32> to vector<2x1xf32>
    %42 = vector.broadcast %41 : vector<2x1xf32> to vector<2x16xf32>
    %43 = arith.subf %42, %1 : vector<2x16xf32>
    %44 = vector.extract_strided_slice %0 {offsets = [0, 14], sizes = [2, 1], strides = [1, 1]} : vector<2x16xf32> to vector<2x1xf32>
    %45 = vector.broadcast %44 : vector<2x1xf32> to vector<2x16xf32>
    %46 = arith.subf %45, %1 : vector<2x16xf32>
    %47 = vector.extract_strided_slice %0 {offsets = [0, 15], sizes = [2, 1], strides = [1, 1]} : vector<2x16xf32> to vector<2x1xf32>
    %48 = vector.broadcast %47 : vector<2x1xf32> to vector<2x16xf32>
    %49 = arith.subf %48, %1 : vector<2x16xf32>
    %50 = tpu.concatenate %4, %7, %10, %13, %16, %19, %22, %25, %28, %31, %34, %37, %40, %43, %46, %49 in 1 : vector<2x16xf32>, vector<2x16xf32>, vector<2x16xf32>, vector<2x16xf32>, vector<2x16xf32>, vector<2x16xf32>, vector<2x16xf32>, vector<2x16xf32>, vector<2x16xf32>, vector<2x16xf32>, vector<2x16xf32>, vector<2x16xf32>, vector<2x16xf32>, vector<2x16xf32>, vector<2x16xf32>, vector<2x16xf32> -> vector<2x256xf32>
    %51 = math.absf %50 : vector<2x256xf32>
    %52 = arith.mulf %50, %50 : vector<2x256xf32>
    %53 = vector.extract_strided_slice %0 {offsets = [0, 0], sizes = [2, 1], strides = [1, 1]} : vector<2x16xf32> to vector<2x1xf32>
    %54 = vector.broadcast %53 : vector<2x1xf32> to vector<2x16xf32>
    %55 = arith.cmpf oeq, %54, %1 : vector<2x16xf32>
    %56 = arith.extui %55 : vector<2x16xi1> to vector<2x16xi32>
    %57 = arith.sitofp %56 : vector<2x16xi32> to vector<2x16xf32>
    %58 = vector.extract_strided_slice %0 {offsets = [0, 1], sizes = [2, 1], strides = [1, 1]} : vector<2x16xf32> to vector<2x1xf32>
    %59 = vector.broadcast %58 : vector<2x1xf32> to vector<2x16xf32>
    %60 = arith.cmpf oeq, %59, %1 : vector<2x16xf32>
    %61 = arith.extui %60 : vector<2x16xi1> to vector<2x16xi32>
    %62 = arith.sitofp %61 : vector<2x16xi32> to vector<2x16xf32>
    %63 = vector.extract_strided_slice %0 {offsets = [0, 2], sizes = [2, 1], strides = [1, 1]} : vector<2x16xf32> to vector<2x1xf32>
    %64 = vector.broadcast %63 : vector<2x1xf32> to vector<2x16xf32>
    %65 = arith.cmpf oeq, %64, %1 : vector<2x16xf32>
    %66 = arith.extui %65 : vector<2x16xi1> to vector<2x16xi32>
    %67 = arith.sitofp %66 : vector<2x16xi32> to vector<2x16xf32>
    %68 = vector.extract_strided_slice %0 {offsets = [0, 3], sizes = [2, 1], strides = [1, 1]} : vector<2x16xf32> to vector<2x1xf32>
    %69 = vector.broadcast %68 : vector<2x1xf32> to vector<2x16xf32>
    %70 = arith.cmpf oeq, %69, %1 : vector<2x16xf32>
    %71 = arith.extui %70 : vector<2x16xi1> to vector<2x16xi32>
    %72 = arith.sitofp %71 : vector<2x16xi32> to vector<2x16xf32>
    %73 = vector.extract_strided_slice %0 {offsets = [0, 4], sizes = [2, 1], strides = [1, 1]} : vector<2x16xf32> to vector<2x1xf32>
    %74 = vector.broadcast %73 : vector<2x1xf32> to vector<2x16xf32>
    %75 = arith.cmpf oeq, %74, %1 : vector<2x16xf32>
    %76 = arith.extui %75 : vector<2x16xi1> to vector<2x16xi32>
    %77 = arith.sitofp %76 : vector<2x16xi32> to vector<2x16xf32>
    %78 = vector.extract_strided_slice %0 {offsets = [0, 5], sizes = [2, 1], strides = [1, 1]} : vector<2x16xf32> to vector<2x1xf32>
    %79 = vector.broadcast %78 : vector<2x1xf32> to vector<2x16xf32>
    %80 = arith.cmpf oeq, %79, %1 : vector<2x16xf32>
    %81 = arith.extui %80 : vector<2x16xi1> to vector<2x16xi32>
    %82 = arith.sitofp %81 : vector<2x16xi32> to vector<2x16xf32>
    %83 = vector.extract_strided_slice %0 {offsets = [0, 6], sizes = [2, 1], strides = [1, 1]} : vector<2x16xf32> to vector<2x1xf32>
    %84 = vector.broadcast %83 : vector<2x1xf32> to vector<2x16xf32>
    %85 = arith.cmpf oeq, %84, %1 : vector<2x16xf32>
    %86 = arith.extui %85 : vector<2x16xi1> to vector<2x16xi32>
    %87 = arith.sitofp %86 : vector<2x16xi32> to vector<2x16xf32>
    %88 = vector.extract_strided_slice %0 {offsets = [0, 7], sizes = [2, 1], strides = [1, 1]} : vector<2x16xf32> to vector<2x1xf32>
    %89 = vector.broadcast %88 : vector<2x1xf32> to vector<2x16xf32>
    %90 = arith.cmpf oeq, %89, %1 : vector<2x16xf32>
    %91 = arith.extui %90 : vector<2x16xi1> to vector<2x16xi32>
    %92 = arith.sitofp %91 : vector<2x16xi32> to vector<2x16xf32>
    %93 = vector.extract_strided_slice %0 {offsets = [0, 8], sizes = [2, 1], strides = [1, 1]} : vector<2x16xf32> to vector<2x1xf32>
    %94 = vector.broadcast %93 : vector<2x1xf32> to vector<2x16xf32>
    %95 = arith.cmpf oeq, %94, %1 : vector<2x16xf32>
    %96 = arith.extui %95 : vector<2x16xi1> to vector<2x16xi32>
    %97 = arith.sitofp %96 : vector<2x16xi32> to vector<2x16xf32>
    %98 = vector.extract_strided_slice %0 {offsets = [0, 9], sizes = [2, 1], strides = [1, 1]} : vector<2x16xf32> to vector<2x1xf32>
    %99 = vector.broadcast %98 : vector<2x1xf32> to vector<2x16xf32>
    %100 = arith.cmpf oeq, %99, %1 : vector<2x16xf32>
    %101 = arith.extui %100 : vector<2x16xi1> to vector<2x16xi32>
    %102 = arith.sitofp %101 : vector<2x16xi32> to vector<2x16xf32>
    %103 = vector.extract_strided_slice %0 {offsets = [0, 10], sizes = [2, 1], strides = [1, 1]} : vector<2x16xf32> to vector<2x1xf32>
    %104 = vector.broadcast %103 : vector<2x1xf32> to vector<2x16xf32>
    %105 = arith.cmpf oeq, %104, %1 : vector<2x16xf32>
    %106 = arith.extui %105 : vector<2x16xi1> to vector<2x16xi32>
    %107 = arith.sitofp %106 : vector<2x16xi32> to vector<2x16xf32>
    %108 = vector.extract_strided_slice %0 {offsets = [0, 11], sizes = [2, 1], strides = [1, 1]} : vector<2x16xf32> to vector<2x1xf32>
    %109 = vector.broadcast %108 : vector<2x1xf32> to vector<2x16xf32>
    %110 = arith.cmpf oeq, %109, %1 : vector<2x16xf32>
    %111 = arith.extui %110 : vector<2x16xi1> to vector<2x16xi32>
    %112 = arith.sitofp %111 : vector<2x16xi32> to vector<2x16xf32>
    %113 = vector.extract_strided_slice %0 {offsets = [0, 12], sizes = [2, 1], strides = [1, 1]} : vector<2x16xf32> to vector<2x1xf32>
    %114 = vector.broadcast %113 : vector<2x1xf32> to vector<2x16xf32>
    %115 = arith.cmpf oeq, %114, %1 : vector<2x16xf32>
    %116 = arith.extui %115 : vector<2x16xi1> to vector<2x16xi32>
    %117 = arith.sitofp %116 : vector<2x16xi32> to vector<2x16xf32>
    %118 = vector.extract_strided_slice %0 {offsets = [0, 13], sizes = [2, 1], strides = [1, 1]} : vector<2x16xf32> to vector<2x1xf32>
    %119 = vector.broadcast %118 : vector<2x1xf32> to vector<2x16xf32>
    %120 = arith.cmpf oeq, %119, %1 : vector<2x16xf32>
    %121 = arith.extui %120 : vector<2x16xi1> to vector<2x16xi32>
    %122 = arith.sitofp %121 : vector<2x16xi32> to vector<2x16xf32>
    %123 = vector.extract_strided_slice %0 {offsets = [0, 14], sizes = [2, 1], strides = [1, 1]} : vector<2x16xf32> to vector<2x1xf32>
    %124 = vector.broadcast %123 : vector<2x1xf32> to vector<2x16xf32>
    %125 = arith.cmpf oeq, %124, %1 : vector<2x16xf32>
    %126 = arith.extui %125 : vector<2x16xi1> to vector<2x16xi32>
    %127 = arith.sitofp %126 : vector<2x16xi32> to vector<2x16xf32>
    %128 = vector.extract_strided_slice %0 {offsets = [0, 15], sizes = [2, 1], strides = [1, 1]} : vector<2x16xf32> to vector<2x1xf32>
    %129 = vector.broadcast %128 : vector<2x1xf32> to vector<2x16xf32>
    %130 = arith.cmpf oeq, %129, %1 : vector<2x16xf32>
    %131 = arith.extui %130 : vector<2x16xi1> to vector<2x16xi32>
    %132 = arith.sitofp %131 : vector<2x16xi32> to vector<2x16xf32>
    %133 = tpu.concatenate %57, %62, %67, %72, %77, %82, %87, %92, %97, %102, %107, %112, %117, %122, %127, %132 in 1 : vector<2x16xf32>, vector<2x16xf32>, vector<2x16xf32>, vector<2x16xf32>, vector<2x16xf32>, vector<2x16xf32>, vector<2x16xf32>, vector<2x16xf32>, vector<2x16xf32>, vector<2x16xf32>, vector<2x16xf32>, vector<2x16xf32>, vector<2x16xf32>, vector<2x16xf32>, vector<2x16xf32>, vector<2x16xf32> -> vector<2x256xf32>
    %c0_3 = arith.constant 0 : index
    %134 = memref.load %arg1[%c0_3] : memref<7xf32, #tpu.memory_space<smem>>
    %135 = vector.broadcast %134 : f32 to vector<2x256xf32>
    %136 = arith.mulf %133, %135 : vector<2x256xf32>
    %c2 = arith.constant 2 : index
    %137 = memref.load %arg1[%c2] : memref<7xf32, #tpu.memory_space<smem>>
    %138 = vector.broadcast %137 : f32 to vector<2x256xf32>
    %139 = arith.mulf %52, %138 : vector<2x256xf32>
    %140 = math.exp %139 : vector<2x256xf32>
    %c1 = arith.constant 1 : index
    %141 = memref.load %arg1[%c1] : memref<7xf32, #tpu.memory_space<smem>>
    %142 = vector.broadcast %141 : f32 to vector<2x256xf32>
    %143 = arith.mulf %140, %142 : vector<2x256xf32>
    %144 = arith.addf %136, %143 : vector<2x256xf32>
    %c4 = arith.constant 4 : index
    %145 = memref.load %arg1[%c4] : memref<7xf32, #tpu.memory_space<smem>>
    %146 = vector.broadcast %145 : f32 to vector<2x256xf32>
    %147 = arith.mulf %51, %146 : vector<2x256xf32>
    %148 = math.sin %147 : vector<2x256xf32>
    %149 = arith.mulf %148, %148 : vector<2x256xf32>
    %c5 = arith.constant 5 : index
    %150 = memref.load %arg1[%c5] : memref<7xf32, #tpu.memory_space<smem>>
    %151 = vector.broadcast %150 : f32 to vector<2x256xf32>
    %152 = arith.mulf %149, %151 : vector<2x256xf32>
    %153 = math.exp %152 : vector<2x256xf32>
    %c3 = arith.constant 3 : index
    %154 = memref.load %arg1[%c3] : memref<7xf32, #tpu.memory_space<smem>>
    %155 = vector.broadcast %154 : f32 to vector<2x256xf32>
    %156 = arith.mulf %153, %155 : vector<2x256xf32>
    %157 = arith.mulf %144, %156 : vector<2x256xf32>
    %c6 = arith.constant 6 : index
    %158 = memref.load %arg1[%c6] : memref<7xf32, #tpu.memory_space<smem>>
    %159 = vector.broadcast %158 : f32 to vector<2x256xf32>
    %160 = arith.addf %157, %159 : vector<2x256xf32>
    %c0_4 = arith.constant 0 : index
    %c0_5 = arith.constant 0 : index
    %161 = vector.load %arg4[%c0_4, %c0_5] : memref<2x256xf32, #tpu.memory_space<vmem>>, vector<2x256xf32>
    tpu.vector_store %arg4[%c0_4, %c0_5], %160 {strides = array<i32>} : memref<2x256xf32, #tpu.memory_space<vmem>>, vector<2x256xf32>,
    return
  }
  func.func @transform_0(%arg0: i32) -> i32 {
    %c0_i32 = arith.constant 0 : i32
    %c0_i32_0 = arith.constant 0 : i32
    return %c0_i32 : i32
  }
  func.func @transform_1(%arg0: i32) -> (i32, i32) {
    %c0_i32 = arith.constant 0 : i32
    %c0_i32_0 = arith.constant 0 : i32
    return %arg0, %c0_i32 : i32, i32
  }
  func.func @transform_2(%arg0: i32) -> (i32, i32) {
    %c0_i32 = arith.constant 0 : i32
    %c0_i32_0 = arith.constant 0 : i32
    return %arg0, %c0_i32 : i32, i32
  }
  func.func @transform_3(%arg0: i32) -> (i32, i32) {
    %c0_i32 = arith.constant 0 : i32
    %c0_i32_0 = arith.constant 0 : i32
    return %arg0, %c0_i32 : i32, i32
  }
}

</mosaic_0001>

<bundles_post_ra>
// kernel: tpu_custom_call.1
= control target key start
LH: loop header
LB: loop body
LE: loop exit
PB: predicated region body
PF: predicated region fallthrough
CT: control target
= control target key end

     0   :  { %8 = vsyncpa [#allocation4], 0  ;;  %s1106_s0 = inlined_call_operand.hbm [shape: f32[7], index: 0, kind: input, shape index: {}]   ;;  %s1107_s1 = inlined_call_operand.vmem [shape: f32[2,16], index: 1, kind: input, shape index: {}]   ;;  %s1108_s2 = inlined_call_operand.vmem [shape: f32[2,16], index: 2, kind: input, shape index: {}]   ;;  %s1109_s3 = inlined_call_operand.hbm [shape: f32[2,256], index: 3, kind: output, shape index: {}]  }
   0x1   :  { %9 = vsyncpa [#allocation3], 0  ;;  %s724_s14 = scalar_lea.hbm %s1106_s0, 16 }
   0x2   :  { %p725_p0 = scmp.ne.s32.totalorder %s1106_s0, %s724_s14  ;;  %p728_p1 = scmp.lt.u32.totalorder %s724_s14, %s1106_s0 }
   0x4   :  { %p730_p2 = pnand %p728_p1, %p725_p0 }
   0x6   :  { %733 = shalt.err (!%p730_p2)
}
   0x7   :  { %s760_s19 = smov [#allocation2]  }
   0x8   :  { %17 = dma.hbm_to_smem %s1106_s0, 16, %s760_s19, [#allocation4]  }
   0x9   :  { %756 = dma.done.wait [#allocation4], 16  }
   0xa   :  { %757 = vsyncadd [#allocation4], 4294967280 }
   0xb   :  { %25 = sfence }
   0xc   :  { %v26_v0 = vld [vmem:[%s1107_s1] sm:$0x3]  ;;  %v761_v1 = vmov 2   ;;  %v762_v2 = vmov 1   ;;  %v763_v3 = vmov 10   ;;  %v764_v4 = vmov 9  }
   0xd   :  { %658 = vset.pattern.permute.xlu1 %v761_v1  ;;  %656 = vset.pattern.permute.xlu0 %v762_v2  ;;  %v765_v5 = vmov 3   ;;  %v766_v6 = vmov 11   ;;  %v767_v7 = vmov 4   ;;  %v768_v8 = vmov 5   ;;  %v830_v17 = vld [vmem:[%s1108_s2] sm:$0x3] }
   0xe   :  { %40 = vperm.xlu1 %658, %v26_v0   ;;  %35 = vperm.xlu0 %656, %v26_v0   ;;  %v769_v9 = vmov 12   ;;  %v770_v10 = vmov 14   ;;  %v771_v11 = vmov 13   ;;  %v772_v12 = vmov 0   ;;  %s777_s24 = smov 16   ;;  %s778_s25 = smov 32  }
   0xf   :  { %v773_v13 = vmov 6   ;;  %v774_v14 = vmov 15   ;;  %v775_v15 = vmov 7   ;;  %v776_v16 = vmov 8   ;;  %s779_s2 = smov 48   ;;  %s780_s26 = smov 64  }
  0x10   :  { %s781_s27 = smov 80   ;;  %v782_v40 = vmov 0.0   ;;  %s783_s28 = smov 96  }
  0x11   :  { %s784_s29 = smov 112   ;;  %s901_s30 = sld [smem:[#allocation2 + $0x4]] }
  0x12   :  { %659 = vset.pattern.permute.xlu1 %v763_v3  ;;  %657 = vset.pattern.permute.xlu0 %v764_v4  ;;  %s904_s4 = sld [smem:[#allocation2 + $0x2]]  ;;  %s924_s5 = sld [smem:[#allocation2 + $0x1]] }
  0x13   :  { %80 = vperm.xlu1 %659, %v26_v0   ;;  %75 = vperm.xlu0 %657, %v26_v0   ;;  %s1010_s6 = sld [smem:[#allocation2]]  ;;  %s1075_s7 = sld [smem:[#allocation2 + $0x5]] }
  0x14   :  { %s613_s8 = sld [smem:[#allocation2 + $0x3]]  ;;  %s614_s9 = sld [smem:[#allocation2 + $0x6]] }
  0x15   :  { %s791_s10 = smov [#allocation5]  }
  0x16   :  { %s576_s11 = sshll.u32 %s791_s10, 4  ;;  %s577_s11 = int_to_ptr.vmem [resolvable:$true] %s576_s11 }
  0x17   :  { %660 = vset.pattern.permute.xlu1 %v765_v5  ;;  %661 = vset.pattern.permute.xlu0 %v766_v6  ;;  %s734_s12 = scalar_lea.vmem %s577_s11, 64  ;;  %p739_p4 = scmp.lt.s32.totalorder %s577_s11, %s577_s11 }
  0x18   :  { %45 = vperm.xlu1 %660, %v26_v0   ;;  %85 = vperm.xlu0 %661, %v26_v0   ;;  %p735_p3 = scmp.ne.s32.totalorder %s577_s11, %s734_s12  ;;  %p740_p5 = scmp.lt.s32.totalorder %s734_s12, %s734_s12 }
  0x1a   :  { %p741_p6 = por %p740_p5, %p739_p4 }
  0x1c   :  { %662 = vset.pattern.permute.xlu1 %v767_v7  ;;  %664 = vset.pattern.permute.xlu0 %v768_v8  ;;  %p742_p7 = pnand %p741_p6, %p735_p3 }
  0x1d   :  { %50 = vperm.xlu1 %662, %v26_v0   ;;  %55 = vperm.xlu0 %664, %v26_v0  }
  0x21   :  { %663 = vset.pattern.permute.xlu1 %v769_v9  ;;  %667 = vset.pattern.permute.xlu0 %v770_v10 }
  0x22   :  { %90 = vperm.xlu1 %663, %v26_v0   ;;  %100 = vperm.xlu0 %667, %v26_v0  }
  0x26   :  { %665 = vset.pattern.permute.xlu1 %v771_v11  ;;  %670 = vset.pattern.permute.xlu0 %v772_v12 }
  0x27   :  { %95 = vperm.xlu1 %665, %v26_v0   ;;  %30 = vperm.xlu0 %670, %v26_v0  }
  0x2b   :  { %666 = vset.pattern.permute.xlu1 %v773_v13  ;;  %707 = vset.pattern.permute.xlu0 %v774_v14 }
  0x2c   :  { %60 = vperm.xlu1 %666, %v26_v0  }
  0x30   :  { %668 = vset.pattern.permute.xlu1 %v775_v15 }
  0x31   :  { %65 = vperm.xlu1 %668, %v26_v0  }
  0x35   :  { %669 = vset.pattern.permute.xlu1 %v774_v14 }
  0x36   :  { %105 = vperm.xlu1 %669, %v26_v0  }
  0x3a   :  { %671 = vset.pattern.permute.xlu1 %v776_v16 }
  0x3b   :  { %70 = vperm.xlu1 %671, %v26_v0  }
  0x8d   :  { %v832_v18 = vpop.permute.xlu1 %40  ;;  %v36_v19 = vpop.permute.xlu0 %35 }
  0x8e   :  { %v38_v20 = vsub.f32 %v36_v19, %v830_v17  ;;  %v43_v21 = vsub.f32 %v832_v18, %v830_v17  ;;  %vm193_vm1 = vcmp.eq.f32.partialorder %v36_v19, %v830_v17  ;;  %vm196_vm6 = vcmp.eq.f32.partialorder %v832_v18, %v830_v17 }
  0x8f   :  { %v586_v47 = vsel %vm193_vm1, 1.0, %v782_v40  ;;  %v587_v55 = vsel %vm196_vm6, 1.0, %v782_v40  ;;  %vm167_vm1 = vcmask 261120   ;;  %vm177_vm6 = vcmask 916480  }
  0x90   :  { %110 = vrot.lane.b32.xlu1 %v38_v20, %s777_s24 }
  0x92   :  { %v81_v22 = vpop.permute.xlu1 %80  ;;  %v76_v23 = vpop.permute.xlu0 %75 }
  0x93   :  { %v78_v24 = vsub.f32 %v76_v23, %v830_v17  ;;  %v83_v25 = vsub.f32 %v81_v22, %v830_v17  ;;  %vm217_vm2 = vcmp.eq.f32.partialorder %v76_v23, %v830_v17  ;;  %vm220_vm5 = vcmp.eq.f32.partialorder %v81_v22, %v830_v17 }
  0x94   :  { %114 = vrot.lane.b32.xlu1 %v43_v21, %s778_s25  ;;  %v594_v48 = vsel %vm217_vm2, 1.0, %v782_v40  ;;  %v595_v54 = vsel %vm220_vm5, 1.0, %v782_v40  ;;  %vm169_vm2 = vcmask 392192   ;;  %vm175_vm5 = vcmask 785408  }
  0x95   :  { %138 = vrot.lane.b32.xlu0 %v78_v24, %s777_s24  ;;  %v672_v49 = vpack.i.bf16 %v594_v48, %v586_v47  ;;  %v677_v57 = vpack.i.bf16 %v595_v54, %v587_v55 }
  0x97   :  { %v46_v26 = vpop.permute.xlu1 %45  ;;  %v86_v28 = vpop.permute.xlu0 %85 }
  0x98   :  { %v48_v27 = vsub.f32 %v46_v26, %v830_v17  ;;  %v88_v29 = vsub.f32 %v86_v28, %v830_v17  ;;  %vm199_vm3 = vcmp.eq.f32.partialorder %v46_v26, %v830_v17  ;;  %vm223_vm4 = vcmp.eq.f32.partialorder %v86_v28, %v830_v17 }
  0x99   :  { %142 = vrot.lane.b32.xlu0 %v83_v25, %s778_s25  ;;  %v588_v51 = vsel %vm199_vm3, 1.0, %v782_v40  ;;  %v596_v52 = vsel %vm223_vm4, 1.0, %v782_v40  ;;  %vm171_vm3 = vcmask 523264   ;;  %vm173_vm4 = vcmask 654336  }
  0x9a   :  { %118 = vrot.lane.b32.xlu1 %v48_v27, %s779_s2  ;;  %v682_v56 = vpack.i.bf16 %v596_v52, %v588_v51 }
  0x9c   :  { %v846_v30 = vpop.permute.xlu1 %50  ;;  %v56_v31 = vpop.permute.xlu0 %55 }
  0x9d   :  { %v53_v32 = vsub.f32 %v846_v30, %v830_v17  ;;  %146 = vrot.lane.b32.xlu0 %v88_v29, %s779_s2  ;;  %v58_v33 = vsub.f32 %v56_v31, %v830_v17  ;;  %vm205_vm7 = vcmp.eq.f32.partialorder %v56_v31, %v830_v17  ;;  %vm202_vm10 = vcmp.eq.f32.partialorder %v846_v30, %v830_v17 }
  0x9e   :  { %v590_v58 = vsel %vm205_vm7, 1.0, %v782_v40  ;;  %v589_v63 = vsel %vm202_vm10, 1.0, %v782_v40  ;;  %v327_v30 = vstv %s901_s30 }
  0x9f   :  { %122 = vrot.lane.b32.xlu1 %v53_v32, %s780_s26 }
  0xa1   :  { %v91_v34 = vpop.permute.xlu1 %90  ;;  %v101_v36 = vpop.permute.xlu0 %100 }
  0xa2   :  { %v93_v35 = vsub.f32 %v91_v34, %v830_v17  ;;  %v103_v42 = vsub.f32 %v101_v36, %v830_v17  ;;  %vm226_vm9 = vcmp.eq.f32.partialorder %v91_v34, %v830_v17  ;;  %vm232_vm13 = vcmp.eq.f32.partialorder %v101_v36, %v830_v17 }
  0xa3   :  { %126 = vrot.lane.b32.xlu1 %v58_v33, %s781_s27  ;;  %v597_v61 = vsel %vm226_vm9, 1.0, %v782_v40  ;;  %v599_v3 = vsel %vm232_vm13, 1.0, %v782_v40  ;;  %v313_v36 = vstv %s904_s4 }
  0xa4   :  { %150 = vrot.lane.b32.xlu0 %v93_v35, %s780_s26  ;;  %v687_v1 = vpack.i.bf16 %v597_v61, %v589_v63 }
  0xa6   :  { %v96_v37 = vpop.permute.xlu1 %95  ;;  %v856_v38 = vpop.permute.xlu0 %30 }
  0xa7   :  { %v98_v39 = vsub.f32 %v96_v37, %v830_v17  ;;  %vm190_vm0 = vcmp.eq.f32.partialorder %v856_v38, %v830_v17  ;;  %vm229_vm8 = vcmp.eq.f32.partialorder %v96_v37, %v830_v17  ;;  %v33_v15 = vsub.f32 %v856_v38, %v830_v17 }
  0xa8   :  { %v861_v41 = vsel %vm190_vm0, 1.0, %v782_v40  ;;  %v598_v59 = vsel %vm229_vm8, 1.0, %v782_v40  ;;  %vm165_vm0 = vcmask 130048  }
  0xa9   :  { %154 = vrot.lane.b32.xlu0 %v98_v39, %s781_s27  ;;  %v692_v0 = vpack.i.bf16 %v598_v59, %v590_v58 }
  0xab   :  { %v61_v43 = vpop.permute.xlu1 %60 }
  0xac   :  { %v63_v44 = vsub.f32 %v61_v43, %v830_v17  ;;  %vm208_vm14 = vcmp.eq.f32.partialorder %v61_v43, %v830_v17 }
  0xad   :  { %158 = vrot.lane.b32.xlu0 %v103_v42, %s783_s28  ;;  %v591_v4 = vsel %vm208_vm14, 1.0, %v782_v40 }
  0xae   :  { %130 = vrot.lane.b32.xlu1 %v63_v44, %s783_s28  ;;  %v697_v7 = vpack.i.bf16 %v599_v3, %v591_v4 }
  0xb0   :  { %v66_v45 = vpop.permute.xlu1 %65 }
  0xb1   :  { %v68_v46 = vsub.f32 %v66_v45, %v830_v17  ;;  %vm211_vm15 = vcmp.eq.f32.partialorder %v66_v45, %v830_v17 }
  0xb2   :  { %v592_v5 = vsel %vm211_vm15, 1.0, %v782_v40 }
  0xb3   :  { %134 = vrot.lane.b32.xlu1 %v68_v46, %s784_s29 }
  0xb5   :  { %v106_v50 = vpop.permute.xlu1 %105 }
  0xb6   :  { %v108_v53 = vsub.f32 %v106_v50, %v830_v17  ;;  %vm235_vm11 = vcmp.eq.f32.partialorder %v106_v50, %v830_v17 }
  0xb7   :  { %673 = vrot.lane.b32.xlu1 %v672_v49, %s777_s24  ;;  %v600_v2 = vsel %vm235_vm11, 1.0, %v782_v40 }
  0xb8   :  { %162 = vrot.lane.b32.xlu0 %v108_v53, %s784_s29  ;;  %v702_v6 = vpack.i.bf16 %v600_v2, %v592_v5 }
  0xba   :  { %v71_v60 = vpop.permute.xlu1 %70 }
  0xbb   :  { %683 = vrot.lane.b32.xlu1 %v682_v56, %s779_s2  ;;  %vm214_vm12 = vcmp.eq.f32.partialorder %v71_v60, %v830_v17  ;;  %v73_v20 = vsub.f32 %v71_v60, %v830_v17 }
  0xbc   :  { %678 = vrot.lane.b32.xlu0 %v677_v57, %s778_s25  ;;  %v891_v62 = vsel %vm214_vm12, 1.0, %v782_v40 }
  0xbf   :  { %693 = vrot.lane.b32.xlu1 %v692_v0, %s781_s27 }
  0xc0   :  { %688 = vrot.lane.b32.xlu0 %v687_v1, %s780_s26 }
  0xc3   :  { %703 = vrot.lane.b32.xlu1 %v702_v6, %s784_s29  ;;  %v321_v6 = vstv %s924_s5 }
  0xc4   :  { %698 = vrot.lane.b32.xlu0 %v697_v7, %s783_s28 }
 0x102   :  { %v111_v8 = vpop.permute.xlu1 %110 }
 0x103   :  { %v166_v19 = vsel %vm165_vm0, %v33_v15, %v111_v8 }
 0x106   :  { %v115_v10 = vpop.permute.xlu1 %114 }
 0x107   :  { %v139_v9 = vpop.permute.xlu0 %138  ;;  %v168_v23 = vsel %vm167_vm1, %v166_v19, %v115_v10 }
 0x108   :  { %v179_v26 = vsel %vm165_vm0, %v73_v20, %v139_v9 }
 0x10b   :  { %v143_v11 = vpop.permute.xlu0 %142 }
 0x10c   :  { %v119_v12 = vpop.permute.xlu1 %118  ;;  %v180_v32 = vsel %vm167_vm1, %v179_v26, %v143_v11 }
 0x10d   :  { %v170_v24 = vsel %vm169_vm2, %v168_v23, %v119_v12 }
 0x10f   :  { %v147_v13 = vpop.permute.xlu0 %146 }
 0x110   :  { %v181_v35 = vsel %vm169_vm2, %v180_v32, %v147_v13 }
 0x111   :  { %v123_v14 = vpop.permute.xlu1 %122 }
 0x112   :  { %v172_v25 = vsel %vm171_vm3, %v170_v24, %v123_v14 }
 0x115   :  { %v127_v18 = vpop.permute.xlu1 %126 }
 0x116   :  { %v151_v16 = vpop.permute.xlu0 %150  ;;  %v174_v17 = vsel %vm173_vm4, %v172_v25, %v127_v18  ;;  %v786_v25 = vmov 2475754826  }
 0x117   :  { %v182_v37 = vsel %vm171_vm3, %v181_v35, %v151_v16 }
 0x11b   :  { %v155_v21 = vpop.permute.xlu0 %154 }
 0x11c   :  { %v183_v40 = vsel %vm173_vm4, %v182_v37, %v155_v21  ;;  %v785_v21 = vmov 683565275   ;;  %v790_v37 = vmov 1326507024  }
 0x11f   :  { %v159_v29 = vpop.permute.xlu0 %158 }
 0x120   :  { %v131_v22 = vpop.permute.xlu1 %130  ;;  %v184_v45 = vsel %vm175_vm5, %v183_v40, %v159_v29 }
 0x121   :  { %v176_v27 = vsel %vm175_vm5, %v174_v17, %v131_v22  ;;  %v787_v17 = vmov 2131351028  }
 0x125   :  { %v135_v28 = vpop.permute.xlu1 %134 }
 0x126   :  { %v178_v31 = vsel %vm177_vm6, %v176_v27, %v135_v28  ;;  %v788_v28 = vmov 2102212464  }
 0x127   :  { %v186_v33 = vand.u32 2147483647, %v178_v31  ;;  %v188_v34 = vmul.f32 %v178_v31, %v178_v31 }
 0x129   :  { %v918_v38 = vmul.f32 %v327_v30, %v186_v33  ;;  %v674_v39 = vpop.permute.xlu1 %673  ;;  %v314_v46 = vmul.f32 %v313_v36, %v188_v34 }
 0x12a   :  { %v676_v42 = vunpack.i.h.bf16 %v674_v39  ;;  %v675_v43 = vunpack.i.l.bf16 %v674_v39  ;;  %v163_v44 = vpop.permute.xlu0 %162 }
 0x12b   :  { %v330_v47 = vand.u32 2147483647, %v918_v38  ;;  %v333_v48 = vand.u32 2139095040, %v918_v38  ;;  %v185_v51 = vsel %vm177_vm6, %v184_v45, %v163_v44  ;;  %v316_v57 = vmul.f32 1.442695, %v314_v46 }
 0x12c   :  { %v301_v49 = vsel %vm165_vm0, %v891_v62, %v676_v42  ;;  %v294_v50 = vsel %vm165_vm0, %v861_v41, %v675_v43  ;;  %v187_v54 = vand.u32 2147483647, %v185_v51  ;;  %v189_v55 = vmul.f32 %v185_v51, %v185_v51 }
 0x12d   :  { %v334_v52 = vshrl.u32 %v333_v48, 23  ;;  %v337_v53 = vand.u32 8388607, %v330_v47  ;;  %v684_v41 = vpop.permute.xlu1 %683  ;;  %708 = vpow2.f32 %v316_v57 }
 0x12e   :  { %v679_v56 = vpop.permute.xlu0 %678  ;;  %v933_v63 = vmul.f32 %v327_v30, %v187_v54  ;;  %v315_v0 = vmul.f32 %v313_v36, %v189_v55  ;;  %v686_v9 = vunpack.i.h.bf16 %v684_v41  ;;  %v685_v10 = vunpack.i.l.bf16 %v684_v41 }
 0x12f   :  { %v604_v58 = vadd.s32 4294967169, %v334_v52  ;;  %v681_v59 = vunpack.i.h.bf16 %v679_v56  ;;  %v680_v60 = vunpack.i.l.bf16 %v679_v56  ;;  %v338_v61 = vor.u32 8388608, %v337_v53 }
 0x130   :  { %v434_v3 = vand.u32 2147483647, %v933_v63  ;;  %v437_v4 = vand.u32 2139095040, %v933_v63  ;;  %v318_v14 = vmul.f32 1.442695, %v315_v0 }
 0x131   :  { %v340_v62 = vadd.s32 1, %v604_v58  ;;  %v302_v1 = vsel %vm167_vm1, %v301_v49, %v681_v59  ;;  %v295_v2 = vsel %vm167_vm1, %v294_v50, %v680_v60  ;;  %v942_v13 = vshll.u32 %v338_v61, 8  ;;  %v973_v60 = vpop.permute.xlu1 %693 }
 0x132   :  { %v939_v5 = vpop.permute.xlu0 %688  ;;  %v438_v8 = vshrl.u32 %v437_v4, 23  ;;  %v946_v15 = vand.u32 8388607, %v434_v3  ;;  %v296_v18 = vsel %vm169_vm2, %v295_v2, %v685_v10  ;;  %v303_v19 = vsel %vm169_vm2, %v302_v1, %v686_v9 }
 0x133   :  { %vm341_vm7 = vcmp.gt.s32.totalorder %v340_v62, 0  ;;  %v691_v16 = vunpack.i.h.bf16 %v939_v5  ;;  %v690_v24 = vunpack.i.l.bf16 %v939_v5  ;;  %v789_v30 = vmov 920167782  }
 0x134   :  { %v342_v7 = vsel %vm341_vm7, %v340_v62, 0  ;;  %v608_v23 = vadd.s32 4294967169, %v438_v8  ;;  %710 = vpow2.f32 %v318_v14  ;;  %v696_v9 = vunpack.i.h.bf16 %v973_v60 }
 0x135   :  { %v343_v11 = vshrl.u32 %v342_v7, 5  ;;  %v344_v12 = vand.u32 31, %v342_v7  ;;  %v963_v48 = vsel %vm171_vm3, %v296_v18, %v690_v24  ;;  %v695_v10 = vunpack.i.l.bf16 %v973_v60  ;;  %v704_v24 = vpop.permute.xlu1 %703 }
 0x136   :  { %v444_v46 = vadd.s32 1, %v608_v23  ;;  %v304_v18 = vsel %vm171_vm3, %v303_v19, %v691_v16 }
 0x137   :  { %v345_v20 = vsub.s32 32, %v344_v12  ;;  %v347_v22 = vshll.u32 %v785_v21, %v344_v12  ;;  %v350_v26 = vshll.u32 %v786_v25, %v344_v12  ;;  %v353_v27 = vshll.u32 %v787_v17, %v344_v12  ;;  %v965_v49 = vpop.eup %708 }
 0x138   :  { %v356_v29 = vshll.u32 %v788_v28, %v344_v12  ;;  %v359_v31 = vshll.u32 %v789_v30, %v344_v12  ;;  %vm362_vm8 = vcmp.lt.s32.totalorder %v343_v11, 1  ;;  %vm364_vm9 = vcmp.lt.s32.totalorder %v343_v11, 3 }
 0x139   :  { %v348_v32 = vshrl.u32 %v786_v25, %v345_v20  ;;  %v351_v33 = vshrl.u32 %v787_v17, %v345_v20  ;;  %v354_v34 = vshrl.u32 %v788_v28, %v345_v20  ;;  %v346_v35 = vshrl.u32 %v785_v21, %v345_v20 }
 0x13a   :  { %v357_v36 = vshrl.u32 %v789_v30, %v345_v20  ;;  %v360_v39 = vshrl.u32 %v790_v37, %v345_v20  ;;  %vm365_vm10 = vcmp.lt.s32.totalorder %v343_v11, 4  ;;  %vm445_vm11 = vcmp.gt.s32.totalorder %v444_v46, 0 }
 0x13b   :  { %v349_v40 = vor.u32 %v348_v32, %v347_v22  ;;  %v352_v42 = vor.u32 %v351_v33, %v350_v26  ;;  %v355_v43 = vor.u32 %v354_v34, %v353_v27  ;;  %vm363_vm12 = vcmp.lt.s32.totalorder %v343_v11, 2 }
 0x13c   :  { %v358_v44 = vor.u32 %v357_v36, %v356_v29  ;;  %v361_v45 = vor.u32 %v360_v39, %v359_v31  ;;  %v446_v59 = vsel %vm445_vm11, %v444_v46, 0  ;;  %v442_v12 = vor.u32 8388608, %v946_v15 }
 0x13d   :  { %v366_v50 = vsel %vm362_vm8, %v346_v35, %v349_v40  ;;  %v367_v51 = vsel %vm365_vm10, %v355_v43, 2102212464  ;;  %v370_v52 = vsel %vm362_vm8, %v349_v40, %v352_v42  ;;  %v374_v53 = vsel %vm362_vm8, %v352_v42, %v355_v43  ;;  %v699_v40 = vpop.permute.xlu0 %698 }
 0x13e   :  { %v368_v54 = vsel %vm364_vm9, %v352_v42, %v367_v51  ;;  %v371_v55 = vsel %vm365_vm10, %v358_v44, 920167782  ;;  %v375_v56 = vsel %vm365_vm10, %v361_v45, 1326507024  ;;  %v975_v41 = vshrl.u32 %v446_v59, 5 }
 0x13f   :  { %v372_v57 = vsel %vm364_vm9, %v355_v43, %v371_v55  ;;  %v376_v58 = vsel %vm364_vm9, %v358_v44, %v375_v56  ;;  %v369_v61 = vsel %vm363_vm12, %v366_v50, %v368_v54  ;;  %v448_v8 = vand.u32 31, %v446_v59  ;;  %v711_v50 = vpop.eup %710 }
 0x140   :  { %v373_v62 = vsel %vm363_vm12, %v370_v52, %v372_v57  ;;  %v377_v0 = vsel %vm363_vm12, %v374_v53, %v376_v58  ;;  %v385_v11 = vmul.u32 %v942_v13, %v369_v61  ;;  %vm466_vm13 = vcmp.lt.s32.totalorder %v975_v41, 1 }
 0x141   :  { %v978_v1 = vmul.u32.u64.low %v942_v13, %v377_v0  ;;  %v979_v2 = vmul.u32.u64.high %v942_v13, %v377_v0, %v978_v1  ;;  %v982_v4 = vmul.u32.u64.low %v942_v13, %v373_v62  ;;  %v983_v7 = vmul.u32.u64.high %v942_v13, %v373_v62, %v982_v4 }
 0x142   :  { %v449_v20 = vsub.s32 32, %v448_v8  ;;  %v451_v22 = vshll.u32 %v785_v21, %v448_v8  ;;  %vm467_vm14 = vcmp.lt.s32.totalorder %v975_v41, 2  ;;  %vm468_vm15 = vcmp.lt.s32.totalorder %v975_v41, 3 }
 0x143   :  { %vm469_vm0 = vcmp.lt.s32.totalorder %v975_v41, 4  ;;  %vm387_vm1 = vc.u32 %v979_v2, %v982_v4  ;;  %v388_v13 = vadd.s32 1, %v983_v7  ;;  %v454_v14 = vshll.u32 %v786_v25, %v448_v8 }
 0x144   :  { %v457_v5 = vshll.u32 %v787_v17, %v448_v8  ;;  %v452_v15 = vshrl.u32 %v786_v25, %v449_v20  ;;  %v455_v16 = vshrl.u32 %v787_v17, %v449_v20  ;;  %v458_v19 = vshrl.u32 %v788_v28, %v449_v20 }
 0x145   :  { %v460_v23 = vshll.u32 %v788_v28, %v448_v8  ;;  %v389_v26 = vsel %vm387_vm1, %v388_v13, %v983_v7  ;;  %v461_v27 = vshrl.u32 %v789_v30, %v449_v20  ;;  %v463_v29 = vshll.u32 %v789_v30, %v448_v8 }
 0x146   :  { %v464_v31 = vshrl.u32 %v790_v37, %v449_v20  ;;  %v390_v32 = vadd.s32 %v389_v26, %v385_v11  ;;  %v453_v33 = vor.u32 %v452_v15, %v451_v22  ;;  %v456_v34 = vor.u32 %v455_v16, %v454_v14 }
 0x147   :  { %v459_v35 = vor.u32 %v458_v19, %v457_v5  ;;  %v462_v25 = vor.u32 %v461_v27, %v460_v23  ;;  %v482_v36 = vshll.u32 %v442_v12, 8  ;;  %v706_v39 = vunpack.i.h.bf16 %v704_v24 }
 0x148   :  { %v465_v17 = vor.u32 %v464_v31, %v463_v29  ;;  %v391_v28 = vadd.s32 536870912, %v390_v32  ;;  %v450_v42 = vshrl.u32 %v785_v21, %v449_v20  ;;  %v474_v43 = vsel %vm466_vm13, %v453_v33, %v456_v34 }
 0x149   :  { %v705_v44 = vunpack.i.l.bf16 %v704_v24  ;;  %v471_v30 = vsel %vm469_vm0, %v459_v35, 2102212464  ;;  %v475_v37 = vsel %vm469_vm0, %v462_v25, 920167782  ;;  %v478_v45 = vsel %vm466_vm13, %v456_v34, %v459_v35 }
 0x14a   :  { %v479_v46 = vsel %vm469_vm0, %v465_v17, 1326507024  ;;  %v1023_v51 = vshrl.u32 %v391_v28, 30  ;;  %v476_v21 = vsel %vm468_vm15, %v459_v35, %v475_v37  ;;  %v701_v53 = vunpack.i.h.bf16 %v699_v40 }
 0x14b   :  { %v480_v52 = vsel %vm468_vm15, %v462_v25, %v479_v46  ;;  %v470_v54 = vsel %vm466_vm13, %v450_v42, %v453_v33  ;;  %v477_v55 = vsel %vm467_vm14, %v474_v43, %v476_v21  ;;  %v700_v57 = vunpack.i.l.bf16 %v699_v40 }
 0x14c   :  { %v481_v56 = vsel %vm467_vm14, %v478_v45, %v480_v52  ;;  %v393_v58 = vshll.u32 %v1023_v51, 30  ;;  %v472_v59 = vsel %vm468_vm15, %v456_v34, %v471_v30  ;;  %v298_v1 = vsel %vm173_vm4, %v963_v48, %v695_v10 }
 0x14d   :  { %v1038_v60 = vmul.u32.u64.low %v482_v36, %v481_v56  ;;  %v1039_v61 = vmul.u32.u64.high %v482_v36, %v481_v56, %v1038_v60  ;;  %v1041_v62 = vmul.u32.u64.low %v482_v36, %v477_v55  ;;  %v1042_v0 = vmul.u32.u64.high %v482_v36, %v477_v55, %v1041_v62 }
 0x14e   :  { %v305_v7 = vsel %vm173_vm4, %v304_v18, %v696_v9  ;;  %v394_v8 = vsub.s32 %v390_v32, %v393_v58  ;;  %v309_v11 = vstv %s1010_s6  ;;  %v299_v12 = vsel %vm175_vm5, %v298_v1, %v700_v57 }
 0x14f   :  { %v306_v20 = vsel %vm175_vm5, %v305_v7, %v701_v53  ;;  %v300_v22 = vsel %vm177_vm6, %v299_v12, %v705_v44  ;;  %v473_v5 = vsel %vm467_vm14, %v470_v54, %v472_v59  ;;  %vm491_vm2 = vc.u32 %v1039_v61, %v1041_v62 }
 0x150   :  { %v307_v13 = vsel %vm177_vm6, %v306_v20, %v706_v39  ;;  %v396_v14 = vsub.s32 0, %v394_v8  ;;  %v322_v48 = vmul.f32 %v965_v49, %v321_v6  ;;  %v492_v9 = vadd.s32 1, %v1042_v0 }
 0x151   :  { %v310_v10 = vmul.f32 %v309_v11, %v300_v22  ;;  %v311_v18 = vmul.f32 %v309_v11, %v307_v13  ;;  %v323_v15 = vmul.f32 %v711_v50, %v321_v6  ;;  %v489_v19 = vmul.u32 %v482_v36, %v473_v5 }
 0x152   :  { %v605_v16 = vmin.u32 %v396_v14, %v394_v8  ;;  %v493_v23 = vsel %vm491_vm2, %v492_v9, %v1042_v0  ;;  %v386_v33 = vadd.s32 %v982_v4, %v979_v2  ;;  %v416_v45 = vsub.s32 4, %v1023_v51 }
 0x153   :  { %v1062_v24 = vadd.f32 %v322_v48, %v310_v10  ;;  %v1064_v26 = vadd.f32 %v323_v15, %v311_v18  ;;  %v494_v27 = vadd.s32 %v493_v23, %v489_v19  ;;  %vm332_vm4 = vcmp.lt.s32.totalorder %v918_v38, 0 }
 0x154   :  { %v398_v41 = vclz %v605_v16  ;;  %v417_v4 = vsel %vm332_vm4, %v416_v45, %v1023_v51  ;;  %vm331_vm6 = vcmp.le.f32.partialorder %v330_v47, 0.7853982  ;;  %v490_v55 = vadd.s32 %v1041_v62, %v1039_v61 }
 0x155   :  { %v495_v31 = vadd.s32 536870912, %v494_v27  ;;  %v419_v58 = vsel %vm331_vm6, 0, %v417_v4  ;;  %vm1079_vm8 = vcmp.le.f32.partialorder %v434_v3, 0.7853982  ;;  %vm436_vm9 = vcmp.lt.s32.totalorder %v933_v63, 0 }
 0x156   :  { %v606_v29 = vadd.s32 4294967294, %v398_v41  ;;  %v423_v7 = vadd.s32 3, %v419_v58  ;;  %vm422_vm12 = vweird.f32 %v918_v38  ;;  %v541_v41 = vstv %s1075_s7 }
 0x157   :  { %v496_v32 = vshrl.u32 %v495_v31, 30  ;;  %vm526_vm0 = vweird.f32 %v933_v63 }
 0x158   :  { %vm607_vm3 = vcmp.lt.s32.totalorder %v606_v29, 0  ;;  %v424_v12 = vand.u32 3, %v423_v7 }
 0x159   :  { %v401_v49 = vsel %vm607_vm3, 0, %v606_v29  ;;  %v497_v35 = vshll.u32 %v496_v32, 30  ;;  %v520_v22 = vsub.s32 4, %v496_v32 }
 0x15a   :  { %v402_v34 = vsub.s32 32, %v401_v49  ;;  %v406_v6 = vsub.s32 4294967266, %v401_v49  ;;  %v403_v25 = vshll.u32 %v394_v8, %v401_v49  ;;  %vm429_vm7 = vcmp.eq.s32.totalorder %v424_v12, 2 }
 0x15b   :  { %v498_v39 = vsub.s32 %v494_v27, %v497_v35  ;;  %vm426_vm10 = vcmp.eq.s32.totalorder %v424_v12, 0  ;;  %v521_v18 = vsel %vm436_vm9, %v520_v22, %v496_v32  ;;  %vm425_vm11 = vcmp.lt.s32.totalorder %v424_v12, 2 }
 0x15c   :  { %v404_v17 = vshrl.u32 %v386_v33, %v402_v34  ;;  %v407_v36 = vadd.s32 127, %v406_v6  ;;  %v523_v23 = vsel %vm1079_vm8, 0, %v521_v18 }
 0x15d   :  { %v500_v42 = vsub.s32 0, %v498_v39  ;;  %v527_v29 = vadd.s32 3, %v523_v23 }
 0x15e   :  { %v405_v40 = vor.u32 %v404_v17, %v403_v25  ;;  %v408_v28 = vshll.u32 %v407_v36, 23 }
 0x15f   :  { %v609_v44 = vmin.u32 %v500_v42, %v498_v39  ;;  %v528_v32 = vand.u32 3, %v527_v29 }
 0x160   :  { %v409_v43 = vor.u32 4788187, %v408_v28  ;;  %v412_v37 = vcvt.s32.f32 %v405_v40 }
 0x161   :  { %v502_v46 = vclz %v609_v44  ;;  %vm533_vm13 = vcmp.eq.s32.totalorder %v528_v32, 2  ;;  %vm530_vm14 = vcmp.eq.s32.totalorder %v528_v32, 0  ;;  %vm529_vm15 = vcmp.lt.s32.totalorder %v528_v32, 2 }
 0x162   :  { %v410_v30 = vand.u32 2147483647, %v409_v43 }
 0x163   :  { %v610_v21 = vadd.s32 4294967294, %v502_v46  ;;  %v555_v46 = vstv %s614_s9 }
 0x164   :  { %v413_v50 = vmul.f32 %v412_v37, %v410_v30 }
 0x165   :  { %vm611_vm5 = vcmp.lt.s32.totalorder %v610_v21, 0 }
 0x166   :  { %v414_v2 = vxor.u32 2147483648, %v413_v50  ;;  %v505_v53 = vsel %vm611_vm5, 0, %v610_v21 }
 0x167   :  { %v506_v56 = vsub.s32 32, %v505_v53  ;;  %v510_v57 = vsub.s32 4294967266, %v505_v53  ;;  %v507_v59 = vshll.u32 %v498_v39, %v505_v53  ;;  %v549_v39 = vstv %s613_s8 }
 0x168   :  { %v415_v52 = vsel %vm332_vm4, %v414_v2, %v413_v50 }
 0x169   :  { %v418_v54 = vsel %vm331_vm6, %v918_v38, %v415_v52  ;;  %v508_v60 = vshrl.u32 %v490_v55, %v506_v56  ;;  %v511_v0 = vadd.s32 127, %v510_v57 }
 0x16a   :  { %712 = vcosq.f32 %v418_v54 }
 0x16b   :  { %714 = vsinq.f32 %v418_v54  ;;  %v509_v1 = vor.u32 %v508_v60, %v507_v59  ;;  %v512_v51 = vshll.u32 %v511_v0, 23 }
 0x16d   :  { %v513_v8 = vor.u32 4788187, %v512_v51  ;;  %v516_v47 = vcvt.s32.f32 %v509_v1 }
 0x16f   :  { %v514_v11 = vand.u32 2147483647, %v513_v8 }
 0x171   :  { %v517_v20 = vmul.f32 %v516_v47, %v514_v11 }
 0x173   :  { %v518_v14 = vxor.u32 2147483648, %v517_v20 }
 0x174   :  { %v713_v61 = vpop.eup %712 }
 0x175   :  { %v715_v62 = vpop.eup %714  ;;  %v430_v13 = vxor.u32 2147483648, %v713_v61  ;;  %v519_v10 = vsel %vm436_vm9, %v518_v14, %v517_v20 }
 0x176   :  { %v427_v5 = vxor.u32 2147483648, %v715_v62  ;;  %v522_v16 = vsel %vm1079_vm8, %v933_v63, %v519_v10 }
 0x177   :  { %v431_v9 = vsel %vm429_vm7, %v430_v13, %v715_v62  ;;  %716 = vcosq.f32 %v522_v16 }
 0x178   :  { %v428_v15 = vsel %vm426_vm10, %v713_v61, %v427_v5  ;;  %718 = vsinq.f32 %v522_v16 }
 0x179   :  { %v432_v19 = vsel %vm425_vm11, %v428_v15, %v431_v9 }
 0x17a   :  { %v433_v3 = vsel %vm422_vm12, nan, %v432_v19 }
 0x17b   :  { %v538_v27 = vmul.f32 %v433_v3, %v433_v3 }
 0x17d   :  { %v542_v31 = vmul.f32 %v541_v41, %v538_v27 }
 0x17f   :  { %v544_v49 = vmul.f32 1.442695, %v542_v31 }
 0x181   :  { %720 = vpow2.f32 %v544_v49  ;;  %v717_v33 = vpop.eup %716 }
 0x182   :  { %v719_v34 = vpop.eup %718  ;;  %v534_v6 = vxor.u32 2147483648, %v717_v33 }
 0x183   :  { %v531_v35 = vxor.u32 2147483648, %v719_v34 }
 0x184   :  { %v535_v38 = vsel %vm533_vm13, %v534_v6, %v719_v34 }
 0x185   :  { %v532_v25 = vsel %vm530_vm14, %v717_v33, %v531_v35 }
 0x186   :  { %v536_v17 = vsel %vm529_vm15, %v532_v25, %v535_v38 }
 0x187   :  { %v537_v36 = vsel %vm526_vm0, nan, %v536_v17 }
 0x188   :  { %v539_v40 = vmul.f32 %v537_v36, %v537_v36 }
 0x18a   :  { %v543_v42 = vmul.f32 %v541_v41, %v539_v40 }
 0x18b   :  { %v721_v28 = vpop.eup %720 }
 0x18c   :  { %v550_v43 = vmul.f32 %v721_v28, %v549_v39  ;;  %v546_v44 = vmul.f32 1.442695, %v543_v42 }
 0x18e   :  { %v552_v30 = vmul.f32 %v550_v43, %v1062_v24  ;;  %722 = vpow2.f32 %v546_v44 }
 0x190   :  { %v556_v63 = vadd.f32 %v555_v46, %v552_v30 }
 0x198   :  { %v723_v37 = vpop.eup %722 }
 0x199   :  { %v551_v45 = vmul.f32 %v723_v37, %v549_v39 }
 0x19b   :  { %v553_v50 = vmul.f32 %v551_v45, %v1064_v26 }
 0x19d   :  { %v557_v21 = vadd.f32 %v555_v46, %v553_v50 }
 0x19f   :  { %v560_v2 = vcombine.low %v556_v63, %v557_v21 }
 0x1a1   :  { %615 = vst.sshfl [vmem:[#allocation5] sm:$0x33 pattern:$0x76325410] %v560_v2 }
 0x1a2   :  { %745 = shalt.err (!%p742_p7)
}
 0x1a3   :  { %s746_s15 = scalar_lea.hbm %s1109_s3, 64 }
 0x1a4   :  { %p747_p8 = scmp.ne.s32.totalorder %s1109_s3, %s746_s15  ;;  %p750_p9 = scmp.lt.u32.totalorder %s746_s15, %s1109_s3 }
 0x1a6   :  { %p752_p10 = pnand %p750_p9, %p747_p8 }
 0x1a8   :  { %755 = shalt.err (!%p752_p10)
}
 0x1a9   :  { %579 = dma.vmem_to_hbm [thread:$0]  %s577_s11, 64, %s1109_s3, [#allocation3]  }
 0x1aa   :  { %758 = dma.done.wait [#allocation3], 64  }
 0x1ab   :  { %759 = vsyncadd [#allocation3], 4294967232 }
 0x1ac   :  { %583 = vsyncpa [#allocation3], 1 }
 0x1ad   :  { %584 = vsyncpa [#allocation4], 1 }

</bundles_post_ra>
